<compile_context>
chip_gen: v7x
topology: tpu7x:2x2x1
jax: 0.10.0
libtpu: 0.0.40
codegen_flags: <defaults>
</compile_context>

<pallas_src>
from functools import partial

import jax
import jax.numpy as jnp
from jax import lax
from jax.experimental import pallas as pl
from jax.experimental.pallas import tpu as pltpu


def _ceil_to(v, m):
    return -(-v // m) * m


def _pick_images_per_step(n, bytes_per_image, budget_bytes):
    """Largest divisor of n that keeps grid >= 2 (when n >= 2) and fits the budget."""
    best = 1
    for b in range(1, n + 1):
        if n % b != 0:
            continue
        if n >= 2 and (n // b) < 2:
            continue
        if b * bytes_per_image > budget_bytes:
            continue
        best = max(best, b)
    return best


def _conv_weight_matrix(w_oihw, cin_p, cout_p):
    """(c_out, c_in, 3, 3) OIHW -> (cout_p, 9*cin_p) bf16, column = tap*cin_p + ci."""
    co, ci, kh, kw = w_oihw.shape
    wt = jnp.transpose(w_oihw.astype(jnp.float32), (0, 2, 3, 1))       # (co, ky, kx, ci)
    wt = jnp.pad(wt, ((0, cout_p - co), (0, 0), (0, 0), (0, cin_p - ci)))
    return wt.reshape(cout_p, kh * kw * cin_p).astype(jnp.bfloat16)


# ----------------------------------------------------------------------------------
# Kernels (grid=(N/B,), B images per step, "parallel" semantics)
# ----------------------------------------------------------------------------------
def _pool_conv_kernel(taps_ref, w_ref, mask_ref, y_ref, st_ref, slab_ref,
                      *, n_img, c_in, c_in_p, wp2, lp):
    """MaxPool2d(2) + conv1 (one fused im2col MXU matmul) + masked BN1 partial sums."""
    # Padded-channel slab rows meet zero weight columns, but must not hold
    # uninitialized (possibly NaN) VMEM; only needed when c_in isn't 16-aligned.
    if c_in_p != c_in:
        slab_ref[...] = jnp.zeros(slab_ref.shape, slab_ref.dtype)

    for b in range(n_img):
        taps = taps_ref[b]                                     # (4, c_in, Wf) bf16
        # MaxPool2d(2): elementwise max of the four pre-strided, zero-bordered frames.
        frame = jnp.maximum(jnp.maximum(taps[0], taps[1]),
                            jnp.maximum(taps[2], taps[3]))
        for dy in range(3):
            for dx in range(3):
                t = dy * 3 + dx
                off = dy * wp2 + dx
                slab_ref[t * c_in_p:t * c_in_p + c_in, b * lp:(b + 1) * lp] = \
                    frame[:, off:off + lp]

    # All 9 taps and all B images in ONE MXU matmul, bf16 in / f32 acc.
    y = jnp.dot(w_ref[...], slab_ref[...], preferred_element_type=jnp.float32)

    msk = mask_ref[...]                                        # (1, lp) interior mask
    c_o = y.shape[0]
    s1 = jnp.zeros((c_o, 1), jnp.float32)
    s2 = jnp.zeros((c_o, 1), jnp.float32)
    for b in range(n_img):
        yb = y[:, b * lp:(b + 1) * lp]
        ym = yb * msk
        s1 = s1 + jnp.sum(ym, axis=1, keepdims=True)
        s2 = s2 + jnp.sum(ym * yb, axis=1, keepdims=True)
        y_ref[b] = yb.astype(y_ref.dtype)                      # lane-dense bf16 store

    # BN partial sums packed into lanes 0/1 of one unmasked 128-wide block.
    lane = lax.broadcasted_iota(jnp.int32, (c_o, 128), 1)
    st_ref[0] = jnp.where(lane == 0, s1, jnp.where(lane == 1, s2, 0.0))


def _bn_conv_kernel(y1_ref, sc_ref, sh_ref, w_ref, mask_ref, y2_ref, st_ref,
                    fw_ref, slab_ref, *, n_img, c_mid_p, wp2, lp, wf):
    """Folded BN1 affine + ReLU -> padded frame -> conv2 (one matmul) + BN2 sums."""
    msk = mask_ref[...]
    sc = sc_ref[...]                    # (c_mid_p, 1) scale = gamma * rsqrt(var+eps)
    sh = sh_ref[...]                    # (c_mid_p, 1) shift = beta - mean * scale
    span0 = wp2 + 1
    zpre = jnp.zeros((c_mid_p, span0), fw_ref.dtype)
    zpost = jnp.zeros((c_mid_p, wf - span0 - lp), fw_ref.dtype)

    for b in range(n_img):
        # Mask zeroes the span-border junk, so the frame keeps exact SAME-conv zero
        # padding with only tiny border clears (no whole-frame clear, no per-row loop).
        h = jnp.maximum(y1_ref[b].astype(jnp.float32) * sc + sh, 0.0) * msk
        base = b * wf
        fw_ref[:, base:base + span0] = zpre
        fw_ref[:, base + span0:base + span0 + lp] = h.astype(fw_ref.dtype)
        fw_ref[:, base + span0 + lp:base + wf] = zpost

    for b in range(n_img):
        base = b * wf
        for dy in range(3):
            for dx in range(3):
                t = dy * 3 + dx
                off = dy * wp2 + dx
                slab_ref[t * c_mid_p:(t + 1) * c_mid_p, b * lp:(b + 1) * lp] = \
                    fw_ref[:, base + off:base + off + lp]

    y = jnp.dot(w_ref[...], slab_ref[...], preferred_element_type=jnp.float32)

    c_o = y.shape[0]
    s1 = jnp.zeros((c_o, 1), jnp.float32)
    s2 = jnp.zeros((c_o, 1), jnp.float32)
    for b in range(n_img):
        yb = y[:, b * lp:(b + 1) * lp]
        ym = yb * msk
        s1 = s1 + jnp.sum(ym, axis=1, keepdims=True)
        s2 = s2 + jnp.sum(ym * yb, axis=1, keepdims=True)
        y2_ref[b] = yb.astype(y2_ref.dtype)

    lane = lax.broadcasted_iota(jnp.int32, (c_o, 128), 1)
    st_ref[0] = jnp.where(lane == 0, s1, jnp.where(lane == 1, s2, 0.0))


# ----------------------------------------------------------------------------------
# Host wrapper
# ----------------------------------------------------------------------------------
def down_pallas(x_nchw, params):
    w1, b1, g1, be1, w2, b2, g2, be2 = params
    del b1, b2    # conv bias directly before BatchNorm cancels exactly in the forward

    n, c_in, h, w = x_nchw.shape
    assert h % 2 == 0 and w % 2 == 0, "MaxPool2d(2) path assumes even H and W"
    hp, wp = h // 2, w // 2
    wp2 = wp + 2
    L = (hp - 1) * wp2 + wp                 # span holding every interior output pixel
    Lp = _ceil_to(L + wp2 + 1, 128)         # lane-padded span (zero tail kept)
    F = (hp + 2) * wp2                      # flattened zero-padded frame length
    Wf = _ceil_to(Lp + 2 * wp2 + 2, 128)    # frame width addressable by all 9 taps
    eps = 1e-5

    c_mid, c_out = w1.shape[0], w2.shape[0]
    c_in_p = _ceil_to(c_in, 16)
    c_mid_p = _ceil_to(c_mid, 16)
    c_out_p = _ceil_to(c_out, 16)

    # Images per grid step: amortize per-step overhead / widen the MXU lane dimension,
    # keep grid >= 2 for v7x's two TensorCores, stay well inside VMEM.
    bpi = (2 * 4 * c_in * Wf * 2 + 2 * (c_mid_p + c_out_p) * Lp * 2
           + 9 * (c_in_p + c_mid_p) * Lp * 2 + c_mid_p * Wf * 2
           + (c_mid_p + c_out_p) * Lp * 4)
    B = _pick_images_per_step(n, bpi, 24 * 1024 * 1024)
    grid_n = n // B

    cparams = pltpu.CompilerParams(dimension_semantics=("parallel",),
                                   vmem_limit_bytes=48 * 1024 * 1024)

    x = x_nchw.astype(jnp.float32)

    def tap_frame(v):   # (n, c_in, hp, wp) -> (n, c_in, Wf) bf16, zero spatial border
        v = jnp.pad(v, ((0, 0), (0, 0), (1, 1), (1, 1)))
        v = v.reshape(n, c_in, F)
        return jnp.pad(v, ((0, 0), (0, 0), (0, Wf - F))).astype(jnp.bfloat16)

    taps = jnp.stack([tap_frame(x[:, :, 0::2, 0::2]), tap_frame(x[:, :, 0::2, 1::2]),
                      tap_frame(x[:, :, 1::2, 0::2]), tap_frame(x[:, :, 1::2, 1::2])],
                     axis=1)                                   # (n, 4, c_in, Wf)

    pos = jnp.arange(Lp)
    mask = (((pos % wp2) < wp) & (pos < L)).astype(jnp.float32).reshape(1, Lp)

    w1m = _conv_weight_matrix(w1, c_in_p, c_mid_p)
    w2m = _conv_weight_matrix(w2, c_mid_p, c_out_p)

    def batch_spec(c, width):
        return pl.BlockSpec((B, c, width), lambda i: (i, 0, 0))

    def stat_spec(c):
        return pl.BlockSpec((1, c, 128), lambda i: (i, 0, 0))

    def fixed_spec(a):                  # resident operand (weights / mask / BN affine)
        return pl.BlockSpec(a.shape, lambda i, nd=a.ndim: (0,) * nd)

    # ---- kernel 1: maxpool + conv1 + masked BN1 partial sums -----------------------
    y1, st1 = pl.pallas_call(
        partial(_pool_conv_kernel, n_img=B, c_in=c_in, c_in_p=c_in_p, wp2=wp2, lp=Lp),
        grid=(grid_n,),
        in_specs=[pl.BlockSpec((B, 4, c_in, Wf), lambda i: (i, 0, 0, 0)),
                  fixed_spec(w1m), fixed_spec(mask)],
        out_specs=[batch_spec(c_mid_p, Lp), stat_spec(c_mid_p)],
        out_shape=[jax.ShapeDtypeStruct((n, c_mid_p, Lp), jnp.bfloat16),
                   jax.ShapeDtypeStruct((grid_n, c_mid_p, 128), jnp.float32)],
        scratch_shapes=[pltpu.VMEM((9 * c_in_p, B * Lp), jnp.bfloat16)],
        compiler_params=cparams,
    )(taps, w1m, mask)

    count = jnp.float32(n * hp * wp)

    def bn_fold(st, gamma, beta, c_p):
        """Reduce per-step sums (O(C) host math) -> folded per-channel affine."""
        tot = jnp.sum(st, axis=0)                         # (c_p, 128); lanes 0/1 used
        mean = tot[:, 0] / count
        var = jnp.maximum(tot[:, 1] / count - mean * mean, 0.0)   # biased, clamped >=0
        g = jnp.pad(gamma.astype(jnp.float32), (0, c_p - gamma.shape[0]))
        b = jnp.pad(beta.astype(jnp.float32), (0, c_p - beta.shape[0]))
        scale = g * lax.rsqrt(var + eps)
        return scale.reshape(c_p, 1), (b - mean * scale).reshape(c_p, 1)

    sc1, sh1 = bn_fold(st1, g1, be1, c_mid_p)

    # ---- kernel 2: BN1 affine + ReLU + conv2 + masked BN2 partial sums -------------
    y2, st2 = pl.pallas_call(
        partial(_bn_conv_kernel, n_img=B, c_mid_p=c_mid_p, wp2=wp2, lp=Lp, wf=Wf),
        grid=(grid_n,),
        in_specs=[batch_spec(c_mid_p, Lp), fixed_spec(sc1), fixed_spec(sh1),
                  fixed_spec(w2m), fixed_spec(mask)],
        out_specs=[batch_spec(c_out_p, Lp), stat_spec(c_out_p)],
        out_shape=[jax.ShapeDtypeStruct((n, c_out_p, Lp), jnp.bfloat16),
                   jax.ShapeDtypeStruct((grid_n, c_out_p, 128), jnp.float32)],
        scratch_shapes=[pltpu.VMEM((c_mid_p, B * Wf), jnp.bfloat16),
                        pltpu.VMEM((9 * c_mid_p, B * Lp), jnp.bfloat16)],
        compiler_params=cparams,
    )(y1, sc1, sh1, w2m, mask)

    sc2, sh2 = bn_fold(st2, g2, be2, c_out_p)

    # Epilogue (fused by XLA, no third kernel): BN2 affine + ReLU + span -> NCHW slice.
    span = y2[:, :c_out, :L].astype(jnp.float32)
    span = jnp.pad(span, ((0, 0), (0, 0), (0, hp * wp2 - L)))
    img = span.reshape(n, c_out, hp, wp2)[:, :, :, :wp]
    out = jnp.maximum(img * sc2[:c_out, 0][None, :, None, None]
                      + sh2[:c_out, 0][None, :, None, None], 0.0)
    return out


# ----------------------------------------------------------------------------------
# Pure-JAX reference mirroring PyTorch Down.forward (training-mode BatchNorm).
# Conv operands are cast to bf16 with f32 accumulation, matching the kernel's MXU
# precision policy.
# ----------------------------------------------------------------------------------
def down_reference(x, params):
    w1, b1, g1, be1, w2, b2, g2, be2 = params

    def conv(h, wc, bc):
        y = lax.conv_general_dilated(
            h.astype(jnp.bfloat16), wc.astype(jnp.bfloat16),
            window_strides=(1, 1), padding=((1, 1), (1, 1)),
            dimension_numbers=("NCHW", "OIHW", "NCHW"),
            preferred_element_type=jnp.float32)
        return y + bc[None, :, None, None]

    def bn_relu(h, g, b):
        mean = jnp.mean(h, axis=(0, 2, 3), keepdims=True)
        var = jnp.mean((h - mean) ** 2, axis=(0, 2, 3), keepdims=True)
        y = (h - mean) * lax.rsqrt(var + 1e-5) * g[None, :, None, None] \
            + b[None, :, None, None]
        return jnp.maximum(y, 0.0)

    p = lax.reduce_window(x, -jnp.inf, lax.max, (1, 1, 2, 2), (1, 1, 2, 2), "VALID")
    h = bn_relu(conv(p, w1, b1), g1, be1)
    return bn_relu(conv(h, w2, b2), g2, be2)


if __name__ == "__main__":
    N, C_IN, C_OUT, H, W = 2, 4, 8, 16, 16
    C_MID = C_OUT   # DoubleConv default: mid_channels = out_channels

    key = jax.random.PRNGKey(0)
    ks = jax.random.split(key, 9)
    w1 = 0.2 * jax.random.normal(ks[0], (C_MID, C_IN, 3, 3), jnp.float32)
    b1 = 0.1 * jax.random.normal(ks[1], (C_MID,), jnp.float32)
    g1 = 1.0 + 0.1 * jax.random.normal(ks[2], (C_MID,), jnp.float32)
    be1 = 0.1 * jax.random.normal(ks[3], (C_MID,), jnp.float32)
    w2 = 0.2 * jax.random.normal(ks[4], (C_OUT, C_MID, 3, 3), jnp.float32)
    b2 = 0.1 * jax.random.normal(ks[5], (C_OUT,), jnp.float32)
    g2 = 1.0 + 0.1 * jax.random.normal(ks[6], (C_OUT,), jnp.float32)
    be2 = 0.1 * jax.random.normal(ks[7], (C_OUT,), jnp.float32)
    x = jax.random.normal(ks[8], (N, C_IN, H, W), jnp.float32)
    params = (w1, b1, g1, be1, w2, b2, g2, be2)

    out = jax.block_until_ready(jax.jit(down_pallas)(x, params))
    ref = jax.block_until_ready(down_reference(x, params))

    assert out.shape == (N, C_OUT, H // 2, W // 2), out.shape
    err = float(jnp.max(jnp.abs(out - ref)))
    # bf16 MXU operands plus bf16 y1/y2 intermediates: tolerance sized for a few bf16
    # ulps propagating through the two-conv / two-BatchNorm cascade.
    assert jnp.allclose(out, ref, atol=3e-2, rtol=3e-2), f"max abs err {err}"
    print("KERNEL_OK")
</pallas_src>

<mosaic_0001>
module attributes {stable_mosaic.version = 11 : i64} {
  func.func @_pool_conv_kernel(%arg0: i32, %arg1: memref<1x4x4x256xbf16, #tpu.memory_space<vmem>>, %arg2: memref<16x144xbf16, #tpu.memory_space<vmem>>, %arg3: memref<1x128xf32, #tpu.memory_space<vmem>>, %arg4: memref<1x16x128xbf16, #tpu.memory_space<vmem>>, %arg5: memref<1x16x128xf32, #tpu.memory_space<vmem>>, %arg6: memref<144x128xbf16, #tpu.memory_space<vmem>>) attributes {dimension_semantics = [#tpu.dimension_semantics<parallel>], iteration_bounds = array<i64: 2>, scalar_prefetch = 0 : i64, scratch_operands = 1 : i64, tpu.core_type = #tpu.core_type<tc>, window_params = [{transform_indices = @transform_0, window_bounds = array<i64: 1, 4, 4, 256>}, {pipeline_mode = #tpu.pipeline_mode<synchronous>, transform_indices = @transform_1, window_bounds = array<i64: 16, 144>}, {pipeline_mode = #tpu.pipeline_mode<synchronous>, transform_indices = @transform_2, window_bounds = array<i64: 1, 128>}, {transform_indices = @transform_3, window_bounds = array<i64: 1, 16, 128>}, {transform_indices = @transform_4, window_bounds = array<i64: 1, 16, 128>}]} {
    %cst = arith.constant 0.000000e+00 : bf16
    %0 = vector.broadcast %cst : bf16 to vector<144x128xbf16>
    %c0 = arith.constant 0 : index
    %c0_0 = arith.constant 0 : index
    %1 = vector.load %arg6[%c0, %c0_0] : memref<144x128xbf16, #tpu.memory_space<vmem>>, vector<144x128xbf16>
    tpu.vector_store %arg6[%c0, %c0_0], %0 {strides = array<i32>} : memref<144x128xbf16, #tpu.memory_space<vmem>>, vector<144x128xbf16>,
    %c0_1 = arith.constant 0 : index
    %c0_2 = arith.constant 0 : index
    %c0_3 = arith.constant 0 : index
    %c0_4 = arith.constant 0 : index
    %2 = vector.load %arg1[%c0_1, %c0_2, %c0_3, %c0_4] : memref<1x4x4x256xbf16, #tpu.memory_space<vmem>>, vector<1x4x4x256xbf16>
    %3 = vector.shape_cast %2 : vector<1x4x4x256xbf16> to vector<4x4x256xbf16>
    %4 = vector.extract_strided_slice %3 {offsets = [0, 0, 0], sizes = [1, 4, 256], strides = [1, 1, 1]} : vector<4x4x256xbf16> to vector<1x4x256xbf16>
    %5 = vector.shape_cast %4 : vector<1x4x256xbf16> to vector<4x256xbf16>
    %6 = vector.extract_strided_slice %3 {offsets = [1, 0, 0], sizes = [1, 4, 256], strides = [1, 1, 1]} : vector<4x4x256xbf16> to vector<1x4x256xbf16>
    %7 = vector.shape_cast %6 : vector<1x4x256xbf16> to vector<4x256xbf16>
    %8 = arith.maximumf %5, %7 : vector<4x256xbf16>
    %9 = vector.extract_strided_slice %3 {offsets = [2, 0, 0], sizes = [1, 4, 256], strides = [1, 1, 1]} : vector<4x4x256xbf16> to vector<1x4x256xbf16>
    %10 = vector.shape_cast %9 : vector<1x4x256xbf16> to vector<4x256xbf16>
    %11 = vector.extract_strided_slice %3 {offsets = [3, 0, 0], sizes = [1, 4, 256], strides = [1, 1, 1]} : vector<4x4x256xbf16> to vector<1x4x256xbf16>
    %12 = vector.shape_cast %11 : vector<1x4x256xbf16> to vector<4x256xbf16>
    %13 = arith.maximumf %10, %12 : vector<4x256xbf16>
    %14 = arith.maximumf %8, %13 : vector<4x256xbf16>
    %15 = vector.extract_strided_slice %14 {offsets = [0, 0], sizes = [4, 128], strides = [1, 1]} : vector<4x256xbf16> to vector<4x128xbf16>
    %c0_5 = arith.constant 0 : index
    %c0_6 = arith.constant 0 : index
    %16 = vector.load %arg6[%c0_5, %c0_6] : memref<144x128xbf16, #tpu.memory_space<vmem>>, vector<4x128xbf16>
    tpu.vector_store %arg6[%c0_5, %c0_6], %15 {strides = array<i32>} : memref<144x128xbf16, #tpu.memory_space<vmem>>, vector<4x128xbf16>,
    %17 = vector.extract_strided_slice %14 {offsets = [0, 1], sizes = [4, 128], strides = [1, 1]} : vector<4x256xbf16> to vector<4x128xbf16>
    %c16 = arith.constant 16 : index
    %c0_7 = arith.constant 0 : index
    %18 = vector.load %arg6[%c16, %c0_7] : memref<144x128xbf16, #tpu.memory_space<vmem>>, vector<4x128xbf16>
    tpu.vector_store %arg6[%c16, %c0_7], %17 {strides = array<i32>} : memref<144x128xbf16, #tpu.memory_space<vmem>>, vector<4x128xbf16>,
    %19 = vector.extract_strided_slice %14 {offsets = [0, 2], sizes = [4, 128], strides = [1, 1]} : vector<4x256xbf16> to vector<4x128xbf16>
    %c32 = arith.constant 32 : index
    %c0_8 = arith.constant 0 : index
    %20 = vector.load %arg6[%c32, %c0_8] : memref<144x128xbf16, #tpu.memory_space<vmem>>, vector<4x128xbf16>
    tpu.vector_store %arg6[%c32, %c0_8], %19 {strides = array<i32>} : memref<144x128xbf16, #tpu.memory_space<vmem>>, vector<4x128xbf16>,
    %21 = vector.extract_strided_slice %14 {offsets = [0, 10], sizes = [4, 128], strides = [1, 1]} : vector<4x256xbf16> to vector<4x128xbf16>
    %c48 = arith.constant 48 : index
    %c0_9 = arith.constant 0 : index
    %22 = vector.load %arg6[%c48, %c0_9] : memref<144x128xbf16, #tpu.memory_space<vmem>>, vector<4x128xbf16>
    tpu.vector_store %arg6[%c48, %c0_9], %21 {strides = array<i32>} : memref<144x128xbf16, #tpu.memory_space<vmem>>, vector<4x128xbf16>,
    %23 = vector.extract_strided_slice %14 {offsets = [0, 11], sizes = [4, 128], strides = [1, 1]} : vector<4x256xbf16> to vector<4x128xbf16>
    %c64 = arith.constant 64 : index
    %c0_10 = arith.constant 0 : index
    %24 = vector.load %arg6[%c64, %c0_10] : memref<144x128xbf16, #tpu.memory_space<vmem>>, vector<4x128xbf16>
    tpu.vector_store %arg6[%c64, %c0_10], %23 {strides = array<i32>} : memref<144x128xbf16, #tpu.memory_space<vmem>>, vector<4x128xbf16>,
    %25 = vector.extract_strided_slice %14 {offsets = [0, 12], sizes = [4, 128], strides = [1, 1]} : vector<4x256xbf16> to vector<4x128xbf16>
    %c80 = arith.constant 80 : index
    %c0_11 = arith.constant 0 : index
    %26 = vector.load %arg6[%c80, %c0_11] : memref<144x128xbf16, #tpu.memory_space<vmem>>, vector<4x128xbf16>
    tpu.vector_store %arg6[%c80, %c0_11], %25 {strides = array<i32>} : memref<144x128xbf16, #tpu.memory_space<vmem>>, vector<4x128xbf16>,
    %27 = vector.extract_strided_slice %14 {offsets = [0, 20], sizes = [4, 128], strides = [1, 1]} : vector<4x256xbf16> to vector<4x128xbf16>
    %c96 = arith.constant 96 : index
    %c0_12 = arith.constant 0 : index
    %28 = vector.load %arg6[%c96, %c0_12] : memref<144x128xbf16, #tpu.memory_space<vmem>>, vector<4x128xbf16>
    tpu.vector_store %arg6[%c96, %c0_12], %27 {strides = array<i32>} : memref<144x128xbf16, #tpu.memory_space<vmem>>, vector<4x128xbf16>,
    %29 = vector.extract_strided_slice %14 {offsets = [0, 21], sizes = [4, 128], strides = [1, 1]} : vector<4x256xbf16> to vector<4x128xbf16>
    %c112 = arith.constant 112 : index
    %c0_13 = arith.constant 0 : index
    %30 = vector.load %arg6[%c112, %c0_13] : memref<144x128xbf16, #tpu.memory_space<vmem>>, vector<4x128xbf16>
    tpu.vector_store %arg6[%c112, %c0_13], %29 {strides = array<i32>} : memref<144x128xbf16, #tpu.memory_space<vmem>>, vector<4x128xbf16>,
    %31 = vector.extract_strided_slice %14 {offsets = [0, 22], sizes = [4, 128], strides = [1, 1]} : vector<4x256xbf16> to vector<4x128xbf16>
    %c128 = arith.constant 128 : index
    %c0_14 = arith.constant 0 : index
    %32 = vector.load %arg6[%c128, %c0_14] : memref<144x128xbf16, #tpu.memory_space<vmem>>, vector<4x128xbf16>
    tpu.vector_store %arg6[%c128, %c0_14], %31 {strides = array<i32>} : memref<144x128xbf16, #tpu.memory_space<vmem>>, vector<4x128xbf16>,
    %c0_15 = arith.constant 0 : index
    %c0_16 = arith.constant 0 : index
    %33 = vector.load %arg2[%c0_15, %c0_16] : memref<16x144xbf16, #tpu.memory_space<vmem>>, vector<16x144xbf16>
    %c0_17 = arith.constant 0 : index
    %c0_18 = arith.constant 0 : index
    %34 = vector.load %arg6[%c0_17, %c0_18] : memref<144x128xbf16, #tpu.memory_space<vmem>>, vector<144x128xbf16>
    %cst_19 = arith.constant dense<0.000000e+00> : vector<16x128xf32>
    %35 = tpu.matmul %33, %34, %cst_19 {dimension_numbers = #tpu.dot_dimension_numbers<[1], [0], [0], [1], [0, 0, 1, 1], [], []>} : vector<16x144xbf16>, vector<144x128xbf16>, vector<16x128xf32> -> vector<16x128xf32>
    %c0_20 = arith.constant 0 : index
    %c0_21 = arith.constant 0 : index
    %36 = vector.load %arg3[%c0_20, %c0_21] : memref<1x128xf32, #tpu.memory_space<vmem>>, vector<1x128xf32>
    %cst_22 = arith.constant 0.000000e+00 : f32
    %37 = vector.broadcast %cst_22 : f32 to vector<16x1xf32>
    %cst_23 = arith.constant 0.000000e+00 : f32
    %38 = vector.broadcast %cst_23 : f32 to vector<16x1xf32>
    %39 = vector.broadcast %36 : vector<1x128xf32> to vector<16x128xf32>
    %40 = arith.mulf %35, %39 : vector<16x128xf32>
    %cst_24 = arith.constant dense<0.000000e+00> : vector<16xf32>
    %41 = vector.multi_reduction <add>, %40, %cst_24 [1] : vector<16x128xf32> to vector<16xf32>
    %42 = vector.shape_cast %41 : vector<16xf32> to vector<16x1xf32>
    %43 = arith.addf %37, %42 : vector<16x1xf32>
    %44 = arith.mulf %40, %35 : vector<16x128xf32>
    %cst_25 = arith.constant dense<0.000000e+00> : vector<16xf32>
    %45 = vector.multi_reduction <add>, %44, %cst_25 [1] : vector<16x128xf32> to vector<16xf32>
    %46 = vector.shape_cast %45 : vector<16xf32> to vector<16x1xf32>
    %47 = arith.addf %38, %46 : vector<16x1xf32>
    %48 = arith.truncf %35 : vector<16x128xf32> to vector<16x128xbf16>
    %c0_26 = arith.constant 0 : index
    %c0_27 = arith.constant 0 : index
    %c0_28 = arith.constant 0 : index
    %49 = vector.load %arg4[%c0_26, %c0_27, %c0_28] : memref<1x16x128xbf16, #tpu.memory_space<vmem>>, vector<1x16x128xbf16>
    %50 = vector.shape_cast %49 : vector<1x16x128xbf16> to vector<16x128xbf16>
    %51 = vector.shape_cast %48 : vector<16x128xbf16> to vector<1x16x128xbf16>
    tpu.vector_store %arg4[%c0_26, %c0_27, %c0_28], %51 {strides = array<i32>} : memref<1x16x128xbf16, #tpu.memory_space<vmem>>, vector<1x16x128xbf16>,
    %52 = tpu.iota {dimensions = array<i32: 1>} : vector<16x128xi32>
    %c0_i32 = arith.constant 0 : i32
    %53 = vector.broadcast %c0_i32 : i32 to vector<16x128xi32>
    %54 = arith.cmpi eq, %52, %53 : vector<16x128xi32>
    %c1_i32 = arith.constant 1 : i32
    %55 = vector.broadcast %c1_i32 : i32 to vector<16x128xi32>
    %56 = arith.cmpi eq, %52, %55 : vector<16x128xi32>
    %cst_29 = arith.constant 0.000000e+00 : f32
    %57 = vector.shape_cast %47 : vector<16x1xf32> to vector<16x1xf32>
    %58 = vector.broadcast %57 : vector<16x1xf32> to vector<16x128xf32>
    %59 = vector.broadcast %cst_29 : f32 to vector<16x128xf32>
    %60 = arith.select %56, %58, %59 : vector<16x128xi1>, vector<16x128xf32>
    %61 = vector.shape_cast %43 : vector<16x1xf32> to vector<16x1xf32>
    %62 = vector.broadcast %61 : vector<16x1xf32> to vector<16x128xf32>
    %63 = arith.select %54, %62, %60 : vector<16x128xi1>, vector<16x128xf32>
    %c0_30 = arith.constant 0 : index
    %c0_31 = arith.constant 0 : index
    %c0_32 = arith.constant 0 : index
    %64 = vector.load %arg5[%c0_30, %c0_31, %c0_32] : memref<1x16x128xf32, #tpu.memory_space<vmem>>, vector<1x16x128xf32>
    %65 = vector.shape_cast %64 : vector<1x16x128xf32> to vector<16x128xf32>
    %66 = vector.shape_cast %63 : vector<16x128xf32> to vector<1x16x128xf32>
    tpu.vector_store %arg5[%c0_30, %c0_31, %c0_32], %66 {strides = array<i32>} : memref<1x16x128xf32, #tpu.memory_space<vmem>>, vector<1x16x128xf32>,
    return
  }
  func.func @transform_0(%arg0: i32) -> (i32, i32, i32, i32) {
    %c0_i32 = arith.constant 0 : i32
    %c0_i32_0 = arith.constant 0 : i32
    %c0_i32_1 = arith.constant 0 : i32
    %c0_i32_2 = arith.constant 0 : i32
    return %arg0, %c0_i32, %c0_i32_0, %c0_i32_1 : i32, i32, i32, i32
  }
  func.func @transform_1(%arg0: i32) -> (i32, i32) {
    %c0_i32 = arith.constant 0 : i32
    %c0_i32_0 = arith.constant 0 : i32
    %c0_i32_1 = arith.constant 0 : i32
    return %c0_i32, %c0_i32_0 : i32, i32
  }
  func.func @transform_2(%arg0: i32) -> (i32, i32) {
    %c0_i32 = arith.constant 0 : i32
    %c0_i32_0 = arith.constant 0 : i32
    %c0_i32_1 = arith.constant 0 : i32
    return %c0_i32, %c0_i32_0 : i32, i32
  }
  func.func @transform_3(%arg0: i32) -> (i32, i32, i32) {
    %c0_i32 = arith.constant 0 : i32
    %c0_i32_0 = arith.constant 0 : i32
    %c0_i32_1 = arith.constant 0 : i32
    return %arg0, %c0_i32, %c0_i32_0 : i32, i32, i32
  }
  func.func @transform_4(%arg0: i32) -> (i32, i32, i32) {
    %c0_i32 = arith.constant 0 : i32
    %c0_i32_0 = arith.constant 0 : i32
    %c0_i32_1 = arith.constant 0 : i32
    return %arg0, %c0_i32, %c0_i32_0 : i32, i32, i32
  }
}

module attributes {stable_mosaic.version = 11 : i64} {
  func.func @_bn_conv_kernel(%arg0: i32, %arg1: memref<1x16x128xbf16, #tpu.memory_space<vmem>>, %arg2: memref<16x1xf32, #tpu.memory_space<vmem>>, %arg3: memref<16x1xf32, #tpu.memory_space<vmem>>, %arg4: memref<16x144xbf16, #tpu.memory_space<vmem>>, %arg5: memref<1x128xf32, #tpu.memory_space<vmem>>, %arg6: memref<1x16x128xbf16, #tpu.memory_space<vmem>>, %arg7: memref<1x16x128xf32, #tpu.memory_space<vmem>>, %arg8: memref<16x256xbf16, #tpu.memory_space<vmem>>, %arg9: memref<144x128xbf16, #tpu.memory_space<vmem>>) attributes {dimension_semantics = [#tpu.dimension_semantics<parallel>], iteration_bounds = array<i64: 2>, scalar_prefetch = 0 : i64, scratch_operands = 2 : i64, tpu.core_type = #tpu.core_type<tc>, window_params = [{transform_indices = @transform_0, window_bounds = array<i64: 1, 16, 128>}, {pipeline_mode = #tpu.pipeline_mode<synchronous>, transform_indices = @transform_1, window_bounds = array<i64: 16, 1>}, {pipeline_mode = #tpu.pipeline_mode<synchronous>, transform_indices = @transform_2, window_bounds = array<i64: 16, 1>}, {pipeline_mode = #tpu.pipeline_mode<synchronous>, transform_indices = @transform_3, window_bounds = array<i64: 16, 144>}, {pipeline_mode = #tpu.pipeline_mode<synchronous>, transform_indices = @transform_4, window_bounds = array<i64: 1, 128>}, {transform_indices = @transform_5, window_bounds = array<i64: 1, 16, 128>}, {transform_indices = @transform_6, window_bounds = array<i64: 1, 16, 128>}]} {
    %c0 = arith.constant 0 : index
    %c0_0 = arith.constant 0 : index
    %0 = vector.load %arg5[%c0, %c0_0] : memref<1x128xf32, #tpu.memory_space<vmem>>, vector<1x128xf32>
    %c0_1 = arith.constant 0 : index
    %c0_2 = arith.constant 0 : index
    %1 = vector.load %arg2[%c0_1, %c0_2] : memref<16x1xf32, #tpu.memory_space<vmem>>, vector<16x1xf32>
    %c0_3 = arith.constant 0 : index
    %c0_4 = arith.constant 0 : index
    %2 = vector.load %arg3[%c0_3, %c0_4] : memref<16x1xf32, #tpu.memory_space<vmem>>, vector<16x1xf32>
    %cst = arith.constant 0.000000e+00 : bf16
    %3 = vector.broadcast %cst : bf16 to vector<16x11xbf16>
    %cst_5 = arith.constant 0.000000e+00 : bf16
    %4 = vector.broadcast %cst_5 : bf16 to vector<16x117xbf16>
    %c0_6 = arith.constant 0 : index
    %c0_7 = arith.constant 0 : index
    %c0_8 = arith.constant 0 : index
    %5 = vector.load %arg1[%c0_6, %c0_7, %c0_8] : memref<1x16x128xbf16, #tpu.memory_space<vmem>>, vector<1x16x128xbf16>
    %6 = vector.shape_cast %5 : vector<1x16x128xbf16> to vector<16x128xbf16>
    %7 = arith.extf %6 : vector<16x128xbf16> to vector<16x128xf32>
    %8 = vector.broadcast %1 : vector<16x1xf32> to vector<16x128xf32>
    %9 = arith.mulf %7, %8 : vector<16x128xf32>
    %10 = vector.broadcast %2 : vector<16x1xf32> to vector<16x128xf32>
    %11 = arith.addf %9, %10 : vector<16x128xf32>
    %cst_9 = arith.constant 0.000000e+00 : f32
    %12 = vector.broadcast %cst_9 : f32 to vector<16x128xf32>
    %13 = arith.maximumf %11, %12 : vector<16x128xf32>
    %14 = vector.broadcast %0 : vector<1x128xf32> to vector<16x128xf32>
    %15 = arith.mulf %13, %14 : vector<16x128xf32>
    %c0_10 = arith.constant 0 : index
    %c0_11 = arith.constant 0 : index
    %16 = vector.load %arg8[%c0_10, %c0_11] : memref<16x256xbf16, #tpu.memory_space<vmem>>, vector<16x11xbf16>
    tpu.vector_store %arg8[%c0_10, %c0_11], %3 {strides = array<i32>} : memref<16x256xbf16, #tpu.memory_space<vmem>>, vector<16x11xbf16>,
    %17 = arith.truncf %15 : vector<16x128xf32> to vector<16x128xbf16>
    %c0_12 = arith.constant 0 : index
    %c11 = arith.constant 11 : index
    %18 = vector.load %arg8[%c0_12, %c11] : memref<16x256xbf16, #tpu.memory_space<vmem>>, vector<16x128xbf16>
    tpu.vector_store %arg8[%c0_12, %c11], %17 {strides = array<i32>} : memref<16x256xbf16, #tpu.memory_space<vmem>>, vector<16x128xbf16>,
    %c0_13 = arith.constant 0 : index
    %c139 = arith.constant 139 : index
    %19 = vector.load %arg8[%c0_13, %c139] : memref<16x256xbf16, #tpu.memory_space<vmem>>, vector<16x117xbf16>
    tpu.vector_store %arg8[%c0_13, %c139], %4 {strides = array<i32>} : memref<16x256xbf16, #tpu.memory_space<vmem>>, vector<16x117xbf16>,
    %c0_14 = arith.constant 0 : index
    %c0_15 = arith.constant 0 : index
    %20 = vector.load %arg8[%c0_14, %c0_15] : memref<16x256xbf16, #tpu.memory_space<vmem>>, vector<16x128xbf16>
    %c0_16 = arith.constant 0 : index
    %c0_17 = arith.constant 0 : index
    %21 = vector.load %arg9[%c0_16, %c0_17] : memref<144x128xbf16, #tpu.memory_space<vmem>>, vector<16x128xbf16>
    tpu.vector_store %arg9[%c0_16, %c0_17], %20 {strides = array<i32>} : memref<144x128xbf16, #tpu.memory_space<vmem>>, vector<16x128xbf16>,
    %c0_18 = arith.constant 0 : index
    %c1 = arith.constant 1 : index
    %22 = vector.load %arg8[%c0_18, %c1] : memref<16x256xbf16, #tpu.memory_space<vmem>>, vector<16x128xbf16>
    %c16 = arith.constant 16 : index
    %c0_19 = arith.constant 0 : index
    %23 = vector.load %arg9[%c16, %c0_19] : memref<144x128xbf16, #tpu.memory_space<vmem>>, vector<16x128xbf16>
    tpu.vector_store %arg9[%c16, %c0_19], %22 {strides = array<i32>} : memref<144x128xbf16, #tpu.memory_space<vmem>>, vector<16x128xbf16>,
    %c0_20 = arith.constant 0 : index
    %c2 = arith.constant 2 : index
    %24 = vector.load %arg8[%c0_20, %c2] : memref<16x256xbf16, #tpu.memory_space<vmem>>, vector<16x128xbf16>
    %c32 = arith.constant 32 : index
    %c0_21 = arith.constant 0 : index
    %25 = vector.load %arg9[%c32, %c0_21] : memref<144x128xbf16, #tpu.memory_space<vmem>>, vector<16x128xbf16>
    tpu.vector_store %arg9[%c32, %c0_21], %24 {strides = array<i32>} : memref<144x128xbf16, #tpu.memory_space<vmem>>, vector<16x128xbf16>,
    %c0_22 = arith.constant 0 : index
    %c10 = arith.constant 10 : index
    %26 = vector.load %arg8[%c0_22, %c10] : memref<16x256xbf16, #tpu.memory_space<vmem>>, vector<16x128xbf16>
    %c48 = arith.constant 48 : index
    %c0_23 = arith.constant 0 : index
    %27 = vector.load %arg9[%c48, %c0_23] : memref<144x128xbf16, #tpu.memory_space<vmem>>, vector<16x128xbf16>
    tpu.vector_store %arg9[%c48, %c0_23], %26 {strides = array<i32>} : memref<144x128xbf16, #tpu.memory_space<vmem>>, vector<16x128xbf16>,
    %c0_24 = arith.constant 0 : index
    %c11_25 = arith.constant 11 : index
    %28 = vector.load %arg8[%c0_24, %c11_25] : memref<16x256xbf16, #tpu.memory_space<vmem>>, vector<16x128xbf16>
    %c64 = arith.constant 64 : index
    %c0_26 = arith.constant 0 : index
    %29 = vector.load %arg9[%c64, %c0_26] : memref<144x128xbf16, #tpu.memory_space<vmem>>, vector<16x128xbf16>
    tpu.vector_store %arg9[%c64, %c0_26], %28 {strides = array<i32>} : memref<144x128xbf16, #tpu.memory_space<vmem>>, vector<16x128xbf16>,
    %c0_27 = arith.constant 0 : index
    %c12 = arith.constant 12 : index
    %30 = vector.load %arg8[%c0_27, %c12] : memref<16x256xbf16, #tpu.memory_space<vmem>>, vector<16x128xbf16>
    %c80 = arith.constant 80 : index
    %c0_28 = arith.constant 0 : index
    %31 = vector.load %arg9[%c80, %c0_28] : memref<144x128xbf16, #tpu.memory_space<vmem>>, vector<16x128xbf16>
    tpu.vector_store %arg9[%c80, %c0_28], %30 {strides = array<i32>} : memref<144x128xbf16, #tpu.memory_space<vmem>>, vector<16x128xbf16>,
    %c0_29 = arith.constant 0 : index
    %c20 = arith.constant 20 : index
    %32 = vector.load %arg8[%c0_29, %c20] : memref<16x256xbf16, #tpu.memory_space<vmem>>, vector<16x128xbf16>
    %c96 = arith.constant 96 : index
    %c0_30 = arith.constant 0 : index
    %33 = vector.load %arg9[%c96, %c0_30] : memref<144x128xbf16, #tpu.memory_space<vmem>>, vector<16x128xbf16>
    tpu.vector_store %arg9[%c96, %c0_30], %32 {strides = array<i32>} : memref<144x128xbf16, #tpu.memory_space<vmem>>, vector<16x128xbf16>,
    %c0_31 = arith.constant 0 : index
    %c21 = arith.constant 21 : index
    %34 = vector.load %arg8[%c0_31, %c21] : memref<16x256xbf16, #tpu.memory_space<vmem>>, vector<16x128xbf16>
    %c112 = arith.constant 112 : index
    %c0_32 = arith.constant 0 : index
    %35 = vector.load %arg9[%c112, %c0_32] : memref<144x128xbf16, #tpu.memory_space<vmem>>, vector<16x128xbf16>
    tpu.vector_store %arg9[%c112, %c0_32], %34 {strides = array<i32>} : memref<144x128xbf16, #tpu.memory_space<vmem>>, vector<16x128xbf16>,
    %c0_33 = arith.constant 0 : index
    %c22 = arith.constant 22 : index
    %36 = vector.load %arg8[%c0_33, %c22] : memref<16x256xbf16, #tpu.memory_space<vmem>>, vector<16x128xbf16>
    %c128 = arith.constant 128 : index
    %c0_34 = arith.constant 0 : index
    %37 = vector.load %arg9[%c128, %c0_34] : memref<144x128xbf16, #tpu.memory_space<vmem>>, vector<16x128xbf16>
    tpu.vector_store %arg9[%c128, %c0_34], %36 {strides = array<i32>} : memref<144x128xbf16, #tpu.memory_space<vmem>>, vector<16x128xbf16>,
    %c0_35 = arith.constant 0 : index
    %c0_36 = arith.constant 0 : index
    %38 = vector.load %arg4[%c0_35, %c0_36] : memref<16x144xbf16, #tpu.memory_space<vmem>>, vector<16x144xbf16>
    %c0_37 = arith.constant 0 : index
    %c0_38 = arith.constant 0 : index
    %39 = vector.load %arg9[%c0_37, %c0_38] : memref<144x128xbf16, #tpu.memory_space<vmem>>, vector<144x128xbf16>
    %cst_39 = arith.constant dense<0.000000e+00> : vector<16x128xf32>
    %40 = tpu.matmul %38, %39, %cst_39 {dimension_numbers = #tpu.dot_dimension_numbers<[1], [0], [0], [1], [0, 0, 1, 1], [], []>} : vector<16x144xbf16>, vector<144x128xbf16>, vector<16x128xf32> -> vector<16x128xf32>
    %cst_40 = arith.constant 0.000000e+00 : f32
    %41 = vector.broadcast %cst_40 : f32 to vector<16x1xf32>
    %cst_41 = arith.constant 0.000000e+00 : f32
    %42 = vector.broadcast %cst_41 : f32 to vector<16x1xf32>
    %43 = vector.broadcast %0 : vector<1x128xf32> to vector<16x128xf32>
    %44 = arith.mulf %40, %43 : vector<16x128xf32>
    %cst_42 = arith.constant dense<0.000000e+00> : vector<16xf32>
    %45 = vector.multi_reduction <add>, %44, %cst_42 [1] : vector<16x128xf32> to vector<16xf32>
    %46 = vector.shape_cast %45 : vector<16xf32> to vector<16x1xf32>
    %47 = arith.addf %41, %46 : vector<16x1xf32>
    %48 = arith.mulf %44, %40 : vector<16x128xf32>
    %cst_43 = arith.constant dense<0.000000e+00> : vector<16xf32>
    %49 = vector.multi_reduction <add>, %48, %cst_43 [1] : vector<16x128xf32> to vector<16xf32>
    %50 = vector.shape_cast %49 : vector<16xf32> to vector<16x1xf32>
    %51 = arith.addf %42, %50 : vector<16x1xf32>
    %52 = arith.truncf %40 : vector<16x128xf32> to vector<16x128xbf16>
    %c0_44 = arith.constant 0 : index
    %c0_45 = arith.constant 0 : index
    %c0_46 = arith.constant 0 : index
    %53 = vector.load %arg6[%c0_44, %c0_45, %c0_46] : memref<1x16x128xbf16, #tpu.memory_space<vmem>>, vector<1x16x128xbf16>
    %54 = vector.shape_cast %53 : vector<1x16x128xbf16> to vector<16x128xbf16>
    %55 = vector.shape_cast %52 : vector<16x128xbf16> to vector<1x16x128xbf16>
    tpu.vector_store %arg6[%c0_44, %c0_45, %c0_46], %55 {strides = array<i32>} : memref<1x16x128xbf16, #tpu.memory_space<vmem>>, vector<1x16x128xbf16>,
    %56 = tpu.iota {dimensions = array<i32: 1>} : vector<16x128xi32>
    %c0_i32 = arith.constant 0 : i32
    %57 = vector.broadcast %c0_i32 : i32 to vector<16x128xi32>
    %58 = arith.cmpi eq, %56, %57 : vector<16x128xi32>
    %c1_i32 = arith.constant 1 : i32
    %59 = vector.broadcast %c1_i32 : i32 to vector<16x128xi32>
    %60 = arith.cmpi eq, %56, %59 : vector<16x128xi32>
    %cst_47 = arith.constant 0.000000e+00 : f32
    %61 = vector.shape_cast %51 : vector<16x1xf32> to vector<16x1xf32>
    %62 = vector.broadcast %61 : vector<16x1xf32> to vector<16x128xf32>
    %63 = vector.broadcast %cst_47 : f32 to vector<16x128xf32>
    %64 = arith.select %60, %62, %63 : vector<16x128xi1>, vector<16x128xf32>
    %65 = vector.shape_cast %47 : vector<16x1xf32> to vector<16x1xf32>
    %66 = vector.broadcast %65 : vector<16x1xf32> to vector<16x128xf32>
    %67 = arith.select %58, %66, %64 : vector<16x128xi1>, vector<16x128xf32>
    %c0_48 = arith.constant 0 : index
    %c0_49 = arith.constant 0 : index
    %c0_50 = arith.constant 0 : index
    %68 = vector.load %arg7[%c0_48, %c0_49, %c0_50] : memref<1x16x128xf32, #tpu.memory_space<vmem>>, vector<1x16x128xf32>
    %69 = vector.shape_cast %68 : vector<1x16x128xf32> to vector<16x128xf32>
    %70 = vector.shape_cast %67 : vector<16x128xf32> to vector<1x16x128xf32>
    tpu.vector_store %arg7[%c0_48, %c0_49, %c0_50], %70 {strides = array<i32>} : memref<1x16x128xf32, #tpu.memory_space<vmem>>, vector<1x16x128xf32>,
    return
  }
  func.func @transform_0(%arg0: i32) -> (i32, i32, i32) {
    %c0_i32 = arith.constant 0 : i32
    %c0_i32_0 = arith.constant 0 : i32
    %c0_i32_1 = arith.constant 0 : i32
    return %arg0, %c0_i32, %c0_i32_0 : i32, i32, i32
  }
  func.func @transform_1(%arg0: i32) -> (i32, i32) {
    %c0_i32 = arith.constant 0 : i32
    %c0_i32_0 = arith.constant 0 : i32
    %c0_i32_1 = arith.constant 0 : i32
    return %c0_i32, %c0_i32_0 : i32, i32
  }
  func.func @transform_2(%arg0: i32) -> (i32, i32) {
    %c0_i32 = arith.constant 0 : i32
    %c0_i32_0 = arith.constant 0 : i32
    %c0_i32_1 = arith.constant 0 : i32
    return %c0_i32, %c0_i32_0 : i32, i32
  }
  func.func @transform_3(%arg0: i32) -> (i32, i32) {
    %c0_i32 = arith.constant 0 : i32
    %c0_i32_0 = arith.constant 0 : i32
    %c0_i32_1 = arith.constant 0 : i32
    return %c0_i32, %c0_i32_0 : i32, i32
  }
  func.func @transform_4(%arg0: i32) -> (i32, i32) {
    %c0_i32 = arith.constant 0 : i32
    %c0_i32_0 = arith.constant 0 : i32
    %c0_i32_1 = arith.constant 0 : i32
    return %c0_i32, %c0_i32_0 : i32, i32
  }
  func.func @transform_5(%arg0: i32) -> (i32, i32, i32) {
    %c0_i32 = arith.constant 0 : i32
    %c0_i32_0 = arith.constant 0 : i32
    %c0_i32_1 = arith.constant 0 : i32
    return %arg0, %c0_i32, %c0_i32_0 : i32, i32, i32
  }
  func.func @transform_6(%arg0: i32) -> (i32, i32, i32) {
    %c0_i32 = arith.constant 0 : i32
    %c0_i32_0 = arith.constant 0 : i32
    %c0_i32_1 = arith.constant 0 : i32
    return %arg0, %c0_i32, %c0_i32_0 : i32, i32, i32
  }
}

</mosaic_0001>

<bundles_post_ra>
// kernel: down_pallas.2
= control target key start
LH: loop header
LB: loop body
LE: loop exit
PB: predicated region body
PF: predicated region fallthrough
CT: control target
= control target key end

     0   :  { %s591_s15 = smov 0   ;;  %s654_s0 = inlined_call_operand.vmem [shape: bf16[2,4,4,256], index: 0, kind: input, shape index: {}]   ;;  %s655_s1 = inlined_call_operand.vmem [shape: bf16[16,144], index: 1, kind: input, shape index: {}]   ;;  %s656_s2 = inlined_call_operand.vmem [shape: f32[1,128], index: 2, kind: input, shape index: {}]   ;;  %s657_s3 = inlined_call_operand.vmem [shape: bf16[2,16,128], index: 3, kind: output, shape index: {0}]   ;;  %s658_s4 = inlined_call_operand.vmem [shape: f32[2,16,128], index: 4, kind: output, shape index: {1}]  }
   0x1 LB: > { %s498_s16 = sadd.s32 4294967295, %s554_s15   ;;  %p502_p0 = scmp.ge.s32.totalorder %s554_s15, 1  ;;  %s554_s15 = sphi %s591_s15, %s15_s15  }
   0x2   : > { %p165_p1 = scmp.lt.s32.totalorder %s554_s15, 3 }
   0x4   : > { %p166_p2 = pnand %p502_p0, %p165_p1 }
   0x5   : > { %p599_p3 = scmp.lt.s32.totalorder (!%p166_p2), %s498_s16, 1  ;;  %v233_v0 = vlaneseq (!%p166_p2)  ;;  %v556_v1 = vmov (!%p166_p2), 1983009808   ;;  %v557_v3 = vmov (!%p166_p2), 0   ;;  %s558_s22 = smov (!%p166_p2), 126   ;;  %vm322_vm0 = vcmask (!%p166_p2), 130048  }
   0x6   : > { %169 = sbr.rel (%p166_p2) target bundleno = 551 (0x227), region = 32  ;;  %v231_v2 = vunpack.c.l.s4 (!%p166_p2), %v556_v1  ;;  %214 = vst [vmem:[#allocation2 + $0x10] sm:$0xff] (!%p166_p2), %v557_v3  ;;  %212 = vst [vmem:[#allocation2] sm:$0xff] (!%p166_p2), %v557_v3  ;;  %326 = vmatprep.subr.bf16.mxu0 (!%p166_p2), %v557_v3  ;;  %s559_s23 = smov (!%p166_p2), 127   ;;  %v547_v17 = vld [vmem:[%s655_s1 + $0x4] ss:$8 sps:$4 sm:$0xff] (!%p166_p2)  }
   0x7   : > { %213 = vst [vmem:[#allocation2 + $0x8] sm:$0xff] (!%p166_p2), %v557_v3  ;;  %215 = vst [vmem:[#allocation2 + $0x18] sm:$0xff] (!%p166_p2), %v557_v3  ;;  %v234_v5 = vshrl.u32 (!%p166_p2), %v233_v0, 7  ;;  %s560_s24 = smov (!%p166_p2), 118   ;;  %s561_s25 = smov (!%p166_p2), 117   ;;  %511 = vmatprep.mubr.msk.bf16.mxu0 (!%p166_p2), %vm322_vm0, %v547_v17  ;;  %vm250_vm1 = vcmask (!%p166_p2), 1031168  }
   0x8   : > { %216 = vst [vmem:[#allocation2 + $0x20] sm:$0xff] (!%p166_p2), %v557_v3  ;;  %217 = vst [vmem:[#allocation2 + $0x28] sm:$0xff] (!%p166_p2), %v557_v3  ;;  %v232_v4 = vunpack.c.0.s8 (!%p166_p2), %v231_v2  ;;  %s562_s26 = smov (!%p166_p2), 116   ;;  %s563_s27 = smov (!%p166_p2), 108   ;;  %vm242_vm2 = vcmask (!%p166_p2), 1039360   ;;  %vm258_vm3 = vcmask (!%p166_p2), 965632  }
   0x9   : > { %218 = vst [vmem:[#allocation2 + $0x30] sm:$0xff] (!%p166_p2), %v557_v3  ;;  %219 = vst [vmem:[#allocation2 + $0x38] sm:$0xff] (!%p166_p2), %v557_v3  ;;  %s564_s28 = smov (!%p166_p2), 107   ;;  %s565_s29 = smov (!%p166_p2), 106   ;;  %vm266_vm4 = vcmask (!%p166_p2), 957440   ;;  %vm274_vm5 = vcmask (!%p166_p2), 949248  }
   0xa   : > { %220 = vst [vmem:[#allocation2 + $0x40] sm:$0xff] (!%p166_p2), %v557_v3  ;;  %v235_v12 = vsub.s32 (!%p166_p2), %v232_v4, %v234_v5  ;;  %vm282_vm6 = vcmask (!%p166_p2), 883712   ;;  %vm290_vm7 = vcmask (!%p166_p2), 875520   ;;  %vm298_vm8 = vcmask (!%p166_p2), 867328   ;;  %v545_v50 = vld [vmem:[%s655_s1] ss:$8 sps:$4 sm:$0xff] (!%p166_p2)  }
   0xb   : > { %v512_v51 = vld [vmem:[%s656_s2] ss:$0 sm:$0xff] (!%p166_p2)  ;;  %v401_v61 = vand.u32 (!%p166_p2), 127, %v233_v0 }
   0xd   : > { %s661_s16 = smov (!%p599_p3, %s498_s16), 1  ;;  %vm403_vm9 = vcmp.eq.s32.totalorder %v401_v61, 1  ;;  %vm402_vm10 = vcmp.eq.s32.totalorder %v401_v61, 0 }
   0xe   : > { %s517_s18 = sshll.u32 %s661_s16, 4  ;;  %s518_s10 = sshll.u32 %s661_s16, 3 }
   0xf   : > { %s200_s21 = scalar_lea.vmem %s654_s0, %s517_s18  ;;  %s205_s13 = scalar_lea.vmem %s657_s3, %s518_s10 }
  0x10   : > { %v221_v6 = vld [vmem:[%s200_s21] sm:$0xf]  ;;  %v222_v7 = vld [vmem:[%s200_s21 + $0x4] sm:$0xf]  ;;  %v223_v8 = vld [vmem:[%s200_s21 + $0x8] sm:$0xf]  ;;  %s210_s19 = scalar_lea.vmem %s658_s4, %s517_s18 }
  0x11   : > { %v224_v9 = vld [vmem:[%s200_s21 + $0xc] sm:$0xf]  ;;  %v225_v10 = vmax.bf16 %v222_v7, %v221_v6 }
  0x12   : > { %v226_v11 = vmax.bf16 %v224_v9, %v223_v8 }
  0x14   : > { %v227_v13 = vmax.bf16 %v226_v11, %v225_v10 }
  0x16   : > { %v236_v14 = vrot.slane %v227_v13, %v235_v12  ;;  %228 = vst [vmem:[#allocation2] sm:$0x3] %v227_v13 }
  0x18   : > { %246 = vrot.lane.b32.xlu1 %v236_v14, %s558_s22  ;;  %238 = vrot.lane.b32.xlu0 %v236_v14, %s559_s23  ;;  %v237_v15 = vcombine.high %v236_v14, %v236_v14 }
  0x1c   : > { %248 = vrot.lane.b32.xlu1 %v237_v15, %s558_s22  ;;  %240 = vrot.lane.b32.xlu0 %v237_v15, %s559_s23 }
  0x1d   : > { %v304_v16 = vld [vmem:[#allocation2] sm:$0xff] }
  0x1e   : > { %327 = vmatpush1.bf16.msra.mxu0 %v304_v16 }
  0x1f   : > { %328 = vmatprep.subr.bf16.mxu0 %v557_v3 }
  0x20   : > { %256 = vrot.lane.b32.xlu1 %v237_v15, %s560_s24  ;;  %254 = vrot.lane.b32.xlu0 %v236_v14, %s560_s24 }
  0x24   : > { %264 = vrot.lane.b32.xlu1 %v237_v15, %s561_s25  ;;  %262 = vrot.lane.b32.xlu0 %v236_v14, %s561_s25 }
  0x28   : > { %272 = vrot.lane.b32.xlu1 %v237_v15, %s562_s26  ;;  %270 = vrot.lane.b32.xlu0 %v236_v14, %s562_s26 }
  0x2c   : > { %280 = vrot.lane.b32.xlu1 %v237_v15, %s563_s27  ;;  %278 = vrot.lane.b32.xlu0 %v236_v14, %s563_s27 }
  0x30   : > { %288 = vrot.lane.b32.xlu1 %v237_v15, %s564_s28  ;;  %286 = vrot.lane.b32.xlu0 %v236_v14, %s564_s28 }
  0x34   : > { %296 = vrot.lane.b32.xlu1 %v237_v15, %s565_s29  ;;  %294 = vrot.lane.b32.xlu0 %v236_v14, %s565_s29 }
  0x8a   : > { %v247_v18 = vpop.permute.xlu1 %246  ;;  %v239_v19 = vpop.permute.xlu0 %238 }
  0x8e   : > { %v249_v20 = vpop.permute.xlu1 %248  ;;  %v241_v21 = vpop.permute.xlu0 %240 }
  0x8f   : > { %v251_v22 = vsel %vm250_vm1, %v247_v18, %v249_v20  ;;  %v243_v23 = vsel %vm242_vm2, %v239_v19, %v241_v21 }
  0x90   : > { %253 = vst [vmem:[#allocation2 + $0x10] sm:$0x3] %v251_v22  ;;  %245 = vst [vmem:[#allocation2 + $0x8] sm:$0x3] %v243_v23 }
  0x92   : > { %v257_v24 = vpop.permute.xlu1 %256  ;;  %v255_v25 = vpop.permute.xlu0 %254 }
  0x93   : > { %v259_v26 = vsel %vm258_vm3, %v255_v25, %v257_v24 }
  0x94   : > { %261 = vst [vmem:[#allocation2 + $0x18] sm:$0x3] %v259_v26 }
  0x96   : > { %v265_v27 = vpop.permute.xlu1 %264  ;;  %v263_v28 = vpop.permute.xlu0 %262 }
  0x97   : > { %v305_v29 = vld [vmem:[#allocation2 + $0x8] sm:$0xff]  ;;  %v267_v30 = vsel %vm266_vm4, %v263_v28, %v265_v27  ;;  %v306_v33 = vld [vmem:[#allocation2 + $0x10] sm:$0xff] }
  0x98   : > { %329 = vmatpush1.bf16.msra.mxu0 %v305_v29  ;;  %269 = vst [vmem:[#allocation2 + $0x20] sm:$0x3] %v267_v30 }
  0x99   : > { %330 = vmatprep.subr.bf16.mxu0 %v557_v3 }
  0x9a   : > { %v273_v31 = vpop.permute.xlu1 %272  ;;  %v271_v32 = vpop.permute.xlu0 %270 }
  0x9b   : > { %v275_v34 = vsel %vm274_vm5, %v271_v32, %v273_v31  ;;  %v307_v35 = vld [vmem:[#allocation2 + $0x18] sm:$0xff] }
  0x9c   : > { %331 = vmatpush1.bf16.msra.mxu0 %v306_v33  ;;  %277 = vst [vmem:[#allocation2 + $0x28] sm:$0x3] %v275_v34 }
  0x9d   : > { %332 = vmatprep.subr.bf16.mxu0 %v557_v3 }
  0x9e   : > { %v281_v36 = vpop.permute.xlu1 %280  ;;  %v279_v37 = vpop.permute.xlu0 %278 }
  0x9f   : > { %v283_v38 = vsel %vm282_vm6, %v279_v37, %v281_v36  ;;  %v308_v39 = vld [vmem:[#allocation2 + $0x20] sm:$0xff] }
  0xa0   : > { %333 = vmatpush1.bf16.msra.mxu0 %v307_v35  ;;  %285 = vst [vmem:[#allocation2 + $0x30] sm:$0x3] %v283_v38 }
  0xa1   : > { %334 = vmatprep.subr.bf16.mxu0 %v557_v3 }
  0xa2   : > { %v289_v40 = vpop.permute.xlu1 %288  ;;  %v287_v41 = vpop.permute.xlu0 %286 }
  0xa3   : > { %v291_v42 = vsel %vm290_vm7, %v287_v41, %v289_v40  ;;  %v309_v43 = vld [vmem:[#allocation2 + $0x28] sm:$0xff] }
  0xa4   : > { %335 = vmatpush1.bf16.msra.mxu0 %v308_v39  ;;  %293 = vst [vmem:[#allocation2 + $0x38] sm:$0x3] %v291_v42 }
  0xa5   : > { %336 = vmatprep.subr.bf16.mxu0 %v557_v3 }
  0xa6   : > { %v297_v44 = vpop.permute.xlu1 %296  ;;  %v295_v45 = vpop.permute.xlu0 %294 }
  0xa7   : > { %v299_v46 = vsel %vm298_vm8, %v295_v45, %v297_v44  ;;  %v310_v47 = vld [vmem:[#allocation2 + $0x30] sm:$0xff] }
  0xa8   : > { %337 = vmatpush1.bf16.msra.mxu0 %v309_v43  ;;  %301 = vst [vmem:[#allocation2 + $0x40] sm:$0x3] %v299_v46 }
  0xa9   : > { %338 = vmatprep.subr.bf16.mxu0 %v557_v3 }
  0xab   : > { %v311_v48 = vld [vmem:[#allocation2 + $0x38] sm:$0xff] }
  0xac   : > { %339 = vmatpush1.bf16.msra.mxu0 %v310_v47 }
  0xad   : > { %340 = vmatprep.subr.bf16.mxu0 %v557_v3 }
  0xaf   : > { %v312_v49 = vld [vmem:[#allocation2 + $0x40] sm:$0xff] }
  0xb0   : > { %341 = vmatpush1.bf16.msra.mxu0 %v311_v48 }
  0xb1   : > { %342 = vmatprep.subr.bf16.mxu0 %v557_v3 }
  0xb4   : > { %343 = vmatpush1.bf16.msra.mxu0 %v312_v49 }
  0xb7   : > { %359 = vmatmul.mubr.bf16.vlgmr.msra.gmra.mrb[0].mxu0 %v545_v50 }
 0x18a   : > { %v360_v52 = vpop.f32.mrb[0].mxu0 }
 0x18b   : > { %v362_v53 = vpop.f32.mrb[1].mxu0  ;;  %v374_v54 = vmul.f32 %v512_v51, %v360_v52 }
 0x18c   : > { %v363_v55 = vpop.f32.mrb[2].mxu0 }
 0x18d   : > { %v525_v56 = vpack.c.bf16 %v363_v55, %v360_v52  ;;  %v365_v57 = vpop.f32.mrb[3].mxu0  ;;  %v382_v58 = vmul.f32 %v374_v54, %v360_v52  ;;  %v375_v59 = vmul.f32 %v512_v51, %v363_v55 }
 0x18f   : > { %526 = vst [vmem:[%s205_s13] sm:$0xff] %v525_v56   ;;  %384 = vadd.xlane.f32.xlu0 %v382_v58  ;;  %v383_v60 = vmul.f32 %v375_v59, %v363_v55 }
 0x191   : > { %386 = vadd.xlane.f32.xlu1 %v383_v60 }
 0x193   : > { %376 = vadd.xlane.f32.xlu0 %v374_v54 }
 0x197   : > { %378 = vadd.xlane.f32.xlu0 %v375_v59 }
 0x21c   : > { %v385_v62 = vpop.xlane.xlu0 %384 }
 0x21d   : > { %v404_v63 = vsel %vm403_vm9, %v385_v62, 0.0 }
 0x21e   : > { %v387_v2 = vpop.xlane.xlu1 %386 }
 0x21f   : > { %v405_v4 = vsel %vm403_vm9, %v387_v2, 0.0 }
 0x220   : > { %v377_v1 = vpop.xlane.xlu0 %376 }
 0x221   : > { %v406_v3 = vsel %vm402_vm10, %v377_v1, %v404_v63 }
 0x222   : > { %408 = vst [vmem:[%s210_s19] sm:$0xff] %v406_v3 }
 0x224   : > { %v379_v5 = vpop.xlane.xlu0 %378 }
 0x225   : > { %v407_v6 = vsel %vm402_vm10, %v379_v5, %v405_v4 }
 0x226   : > { %409 = vst [vmem:[%s210_s19 + $0x8] sm:$0xff] %v407_v6 }
 0x227 PF: > { %s15_s15 = sadd.s32 1, %s554_s15  }
 0x228   : > { %p12_p4 = scmp.ge.s32.totalorder %s15_s15, 4  }
 0x22a   :  { %14 = sbr.rel (!%p12_p4) target bundleno = 1 (0x1), region = 74 }

// kernel: down_pallas.3
= control target key start
LH: loop header
LB: loop body
LE: loop exit
PB: predicated region body
PF: predicated region fallthrough
CT: control target
= control target key end

     0   :  { %s716_s21 = smov 0   ;;  %s786_s0 = inlined_call_operand.vmem [shape: bf16[2,16,128], index: 0, kind: input, shape index: {}]   ;;  %s787_s1 = inlined_call_operand.vmem [shape: f32[16,1], index: 1, kind: input, shape index: {}]   ;;  %s788_s2 = inlined_call_operand.vmem [shape: f32[16,1], index: 2, kind: input, shape index: {}]   ;;  %s789_s3 = inlined_call_operand.vmem [shape: bf16[16,144], index: 3, kind: input, shape index: {}]   ;;  %s790_s4 = inlined_call_operand.vmem [shape: f32[1,128], index: 4, kind: input, shape index: {}]   ;;  %s791_s5 = inlined_call_operand.vmem [shape: bf16[2,16,128], index: 5, kind: output, shape index: {0}]   ;;  %s792_s6 = inlined_call_operand.vmem [shape: f32[2,16,128], index: 6, kind: output, shape index: {1}]  }
   0x1 LB: > { %s607_s22 = sadd.s32 4294967295, %s669_s21   ;;  %p611_p0 = scmp.ge.s32.totalorder %s669_s21, 1  ;;  %s669_s21 = sphi %s716_s21, %s17_s21  }
   0x2   : > { %p215_p1 = scmp.lt.s32.totalorder %s669_s21, 3 }
   0x4   : > { %p216_p2 = pnand %p611_p0, %p215_p1 }
   0x5   : > { %v269_v0 = vld [vmem:[%s788_s2] sm:$0xff] (!%p216_p2)  ;;  %v671_v2 = vmov (!%p216_p2), 0   ;;  %v270_v3 = vld [vmem:[%s788_s2 + $0x8] sm:$0xff] (!%p216_p2)  ;;  %vm309_vm0 = vcmask (!%p216_p2), 89088   ;;  %p250_p3 = scmp.lt.s32.totalorder (!%p216_p2), %s607_s22, 1  ;;  %s672_s13 = smov (!%p216_p2), 11   ;;  %v509_v60 = vlaneseq (!%p216_p2) }
   0x6   : > { %219 = sbr.rel (%p216_p2) target bundleno = 787 (0x313), region = 40  ;;  %v267_v1 = vld [vmem:[%s787_s1] sm:$0xff] (!%p216_p2)  ;;  %659 = vset.pattern.permute.xlu1 (!%p216_p2), %v671_v2  ;;  %658 = vset.pattern.permute.xlu0 (!%p216_p2), %v671_v2  ;;  %v268_v4 = vld [vmem:[%s787_s1 + $0x8] sm:$0xff] (!%p216_p2)  ;;  %310 = vst.msk [vmem:[#allocation2] sm:$0xff] (!%p216_p2), %vm309_vm0, %v671_v2  ;;  %vm316_vm1 = vcmask (!%p216_p2), 1047640   ;;  %s673_s14 = smov (!%p216_p2), 127  }
   0x7   : > { %289 = vperm.xlu1 (!%p216_p2), %659, %v269_v0   ;;  %277 = vperm.xlu0 (!%p216_p2), %658, %v267_v1   ;;  %v752_v17 = vld [vmem:[%s790_s4] ss:$0 sm:$0xff] (!%p216_p2)  ;;  %s674_s15 = smov (!%p216_p2), 126   ;;  %s675_s16 = smov (!%p216_p2), 118   ;;  %v662_v25 = vld [vmem:[%s789_s3 + $0x4] ss:$8 sps:$4 sm:$0xff] (!%p216_p2)  }
   0x8   : > { %442 = vmatprep.subr.bf16.mxu0 (!%p216_p2), %v671_v2  ;;  %s676_s17 = smov (!%p216_p2), 117   ;;  %s677_s18 = smov (!%p216_p2), 116   ;;  %vm438_vm2 = vcmask (!%p216_p2), 130048   ;;  %vm330_vm3 = vcmask (!%p216_p2), 1039360   ;;  %vm342_vm4 = vcmask (!%p216_p2), 1031168   ;;  %vm354_vm5 = vcmask (!%p216_p2), 965632  }
   0x9   : > { %621 = vmatprep.mubr.msk.bf16.mxu0 (!%p216_p2), %vm438_vm2, %v662_v25  ;;  %s678_s23 = smov (!%p216_p2), 108   ;;  %s679_s24 = smov (!%p216_p2), 107   ;;  %vm366_vm6 = vcmask (!%p216_p2), 957440   ;;  %vm378_vm7 = vcmask (!%p216_p2), 949248   ;;  %vm390_vm8 = vcmask (!%p216_p2), 883712   ;;  %vm402_vm9 = vcmask (!%p216_p2), 875520  }
   0xa   : > { %s680_s25 = smov (!%p216_p2), 106   ;;  %vm414_vm10 = vcmask (!%p216_p2), 867328   ;;  %v660_v50 = vld [vmem:[%s789_s3] ss:$8 sps:$4 sm:$0xff] (!%p216_p2)   ;;  %v510_v61 = vand.u32 (!%p216_p2), 127, %v509_v60 }
   0xb   : > { %294 = vperm.xlu1 (!%p216_p2), %659, %v270_v3   ;;  %282 = vperm.xlu0 (!%p216_p2), %658, %v268_v4  }
   0xc   : > { %vm512_vm11 = vcmp.eq.s32.totalorder (!%p216_p2), %v510_v61, 1  ;;  %vm511_vm12 = vcmp.eq.s32.totalorder (!%p216_p2), %v510_v61, 0 }
   0xd   : > { %s794_s22 = smov (!%p250_p3, %s607_s22), 1 }
   0xe   : > { %s626_s7 = sshll.u32 %s794_s22, 3  ;;  %s628_s8 = sshll.u32 %s794_s22, 4 }
   0xf   : > { %s254_s10 = scalar_lea.vmem %s786_s0, %s626_s7  ;;  %s259_s30 = scalar_lea.vmem %s791_s5, %s626_s7 }
  0x10   : > { %v632_v5 = vld [vmem:[%s254_s10] sm:$0xff]   ;;  %s264_s10 = scalar_lea.vmem %s792_s6, %s628_s8 }
  0x11   : > { %v633_v6 = vunpack.c.l.bf16 %v632_v5  ;;  %v634_v10 = vunpack.c.h.bf16 %v632_v5 }
  0x86   : > { %v290_v7 = vpop.permute.xlu1 %289  ;;  %v278_v8 = vpop.permute.xlu0 %277 }
  0x87   : > { %v285_v9 = vmul.f32 %v633_v6, %v278_v8 }
  0x89   : > { %v297_v11 = vadd.f32 %v290_v7, %v285_v9 }
  0x8a   : > { %v283_v12 = vpop.permute.xlu0 %282  ;;  %v295_v14 = vpop.permute.xlu1 %294 }
  0x8b   : > { %v286_v13 = vmul.f32 %v634_v10, %v283_v12  ;;  %v299_v15 = vmax.f32 %v297_v11, 0.0 }
  0x8d   : > { %v298_v16 = vadd.f32 %v295_v14, %v286_v13  ;;  %v307_v19 = vmul.f32 %v752_v17, %v299_v15 }
  0x8f   : > { %v300_v18 = vmax.f32 %v298_v16, 0.0 }
  0x91   : > { %v308_v20 = vmul.f32 %v752_v17, %v300_v18 }
  0x93   : > { %v311_v21 = vpack.c.bf16 %v308_v20, %v307_v19 }
  0x95   : > { %313 = vrot.lane.b32.xlu0 %v311_v21, %s672_s13 }
 0x107   : > { %v314_v22 = vpop.permute.xlu0 %313 }
 0x108   : > { %317 = vst.msk [vmem:[#allocation2] sm:$0xff] %vm316_vm1, %v314_v22 }
 0x109   : > { %318 = vst.msk [vmem:[#allocation2 + $0x8] sm:$0xff] %vm309_vm0, %v314_v22 }
 0x10a   : > { %319 = vst.msk [vmem:[#allocation2 + $0x8] sm:$0xff] %vm316_vm1, %v671_v2 }
 0x10f   : > { %v322_v23 = vld [vmem:[#allocation2] sm:$0xff] }
 0x110   : > { %326 = vrot.lane.b32.xlu1 %v322_v23, %s673_s14  ;;  %443 = vmatpush1.bf16.msra.mxu0 %v322_v23 }
 0x111   : > { %v323_v24 = vld [vmem:[#allocation2 + $0x8] sm:$0xff]  ;;  %444 = vmatprep.subr.bf16.mxu0 %v671_v2 }
 0x112   : > { %328 = vrot.lane.b32.xlu0 %v323_v24, %s673_s14 }
 0x114   : > { %338 = vrot.lane.b32.xlu1 %v322_v23, %s674_s15 }
 0x116   : > { %340 = vrot.lane.b32.xlu0 %v323_v24, %s674_s15 }
 0x118   : > { %350 = vrot.lane.b32.xlu1 %v322_v23, %s675_s16 }
 0x11a   : > { %352 = vrot.lane.b32.xlu0 %v323_v24, %s675_s16 }
 0x11c   : > { %362 = vrot.lane.b32.xlu1 %v322_v23, %s676_s17 }
 0x11e   : > { %364 = vrot.lane.b32.xlu0 %v323_v24, %s676_s17 }
 0x120   : > { %374 = vrot.lane.b32.xlu1 %v322_v23, %s677_s18 }
 0x122   : > { %376 = vrot.lane.b32.xlu0 %v323_v24, %s677_s18 }
 0x124   : > { %386 = vrot.lane.b32.xlu1 %v322_v23, %s678_s23 }
 0x126   : > { %388 = vrot.lane.b32.xlu0 %v323_v24, %s678_s23 }
 0x128   : > { %398 = vrot.lane.b32.xlu1 %v322_v23, %s679_s24 }
 0x12a   : > { %400 = vrot.lane.b32.xlu0 %v323_v24, %s679_s24 }
 0x12c   : > { %410 = vrot.lane.b32.xlu1 %v322_v23, %s680_s25 }
 0x12e   : > { %412 = vrot.lane.b32.xlu0 %v323_v24, %s680_s25 }
 0x182   : > { %v327_v26 = vpop.permute.xlu1 %326 }
 0x184   : > { %v329_v27 = vpop.permute.xlu0 %328 }
 0x185   : > { %v331_v28 = vsel %vm330_vm3, %v327_v26, %v329_v27 }
 0x186   : > { %445 = vmatpush1.bf16.msra.mxu0 %v331_v28  ;;  %v339_v29 = vpop.permute.xlu1 %338 }
 0x187   : > { %446 = vmatprep.subr.bf16.mxu0 %v671_v2 }
 0x188   : > { %v341_v30 = vpop.permute.xlu0 %340 }
 0x189   : > { %v343_v31 = vsel %vm342_vm4, %v339_v29, %v341_v30 }
 0x18a   : > { %447 = vmatpush1.bf16.msra.mxu0 %v343_v31  ;;  %v351_v32 = vpop.permute.xlu1 %350 }
 0x18b   : > { %448 = vmatprep.subr.bf16.mxu0 %v671_v2 }
 0x18c   : > { %v353_v33 = vpop.permute.xlu0 %352 }
 0x18d   : > { %v355_v34 = vsel %vm354_vm5, %v351_v32, %v353_v33 }
 0x18e   : > { %449 = vmatpush1.bf16.msra.mxu0 %v355_v34  ;;  %v363_v35 = vpop.permute.xlu1 %362 }
 0x18f   : > { %450 = vmatprep.subr.bf16.mxu0 %v671_v2 }
 0x190   : > { %v365_v36 = vpop.permute.xlu0 %364 }
 0x191   : > { %v367_v37 = vsel %vm366_vm6, %v363_v35, %v365_v36 }
 0x192   : > { %451 = vmatpush1.bf16.msra.mxu0 %v367_v37  ;;  %v375_v38 = vpop.permute.xlu1 %374 }
 0x193   : > { %452 = vmatprep.subr.bf16.mxu0 %v671_v2 }
 0x194   : > { %v377_v39 = vpop.permute.xlu0 %376 }
 0x195   : > { %v379_v40 = vsel %vm378_vm7, %v375_v38, %v377_v39 }
 0x196   : > { %453 = vmatpush1.bf16.msra.mxu0 %v379_v40  ;;  %v387_v41 = vpop.permute.xlu1 %386 }
 0x197   : > { %454 = vmatprep.subr.bf16.mxu0 %v671_v2 }
 0x198   : > { %v389_v42 = vpop.permute.xlu0 %388 }
 0x199   : > { %v391_v43 = vsel %vm390_vm8, %v387_v41, %v389_v42 }
 0x19a   : > { %455 = vmatpush1.bf16.msra.mxu0 %v391_v43  ;;  %v399_v44 = vpop.permute.xlu1 %398 }
 0x19b   : > { %456 = vmatprep.subr.bf16.mxu0 %v671_v2 }
 0x19c   : > { %v401_v45 = vpop.permute.xlu0 %400 }
 0x19d   : > { %v403_v46 = vsel %vm402_vm9, %v399_v44, %v401_v45 }
 0x19e   : > { %457 = vmatpush1.bf16.msra.mxu0 %v403_v46  ;;  %v411_v47 = vpop.permute.xlu1 %410 }
 0x19f   : > { %458 = vmatprep.subr.bf16.mxu0 %v671_v2 }
 0x1a0   : > { %v413_v48 = vpop.permute.xlu0 %412 }
 0x1a1   : > { %v415_v49 = vsel %vm414_vm10, %v411_v47, %v413_v48 }
 0x1a2   : > { %459 = vmatpush1.bf16.msra.mxu0 %v415_v49 }
 0x1a5   : > { %475 = vmatmul.mubr.bf16.vlgmr.msra.gmra.mrb[0].mxu0 %v660_v50 }
 0x278   : > { %v476_v51 = vpop.f32.mrb[0].mxu0 }
 0x279   : > { %v478_v52 = vpop.f32.mrb[1].mxu0  ;;  %v483_v53 = vmul.f32 %v752_v17, %v476_v51 }
 0x27a   : > { %v479_v54 = vpop.f32.mrb[2].mxu0 }
 0x27b   : > { %v638_v55 = vpack.c.bf16 %v479_v54, %v476_v51  ;;  %v481_v56 = vpop.f32.mrb[3].mxu0  ;;  %v491_v57 = vmul.f32 %v483_v53, %v476_v51  ;;  %v484_v58 = vmul.f32 %v752_v17, %v479_v54 }
 0x27d   : > { %639 = vst [vmem:[%s259_s30] sm:$0xff] %v638_v55   ;;  %493 = vadd.xlane.f32.xlu1 %v491_v57  ;;  %v492_v59 = vmul.f32 %v484_v58, %v479_v54 }
 0x27f   : > { %495 = vadd.xlane.f32.xlu0 %v492_v59 }
 0x281   : > { %487 = vadd.xlane.f32.xlu1 %v484_v58 }
 0x283   : > { %485 = vadd.xlane.f32.xlu0 %v483_v53 }
 0x30a   : > { %v494_v62 = vpop.xlane.xlu1 %493 }
 0x30b   : > { %v513_v3 = vsel %vm512_vm11, %v494_v62, 0.0 }
 0x30c   : > { %v496_v63 = vpop.xlane.xlu0 %495 }
 0x30d   : > { %v514_v0 = vsel %vm512_vm11, %v496_v63, 0.0 }
 0x30e   : > { %v488_v1 = vpop.xlane.xlu1 %487 }
 0x30f   : > { %v516_v2 = vsel %vm511_vm12, %v488_v1, %v514_v0 }
 0x310   : > { %518 = vst [vmem:[%s264_s10 + $0x8] sm:$0xff] %v516_v2  ;;  %v486_v4 = vpop.xlane.xlu0 %485 }
 0x311   : > { %v515_v5 = vsel %vm511_vm12, %v486_v4, %v513_v3 }
 0x312   : > { %517 = vst [vmem:[%s264_s10] sm:$0xff] %v515_v5 }
 0x313 PF: > { %s17_s21 = sadd.s32 1, %s669_s21  }
 0x314   : > { %p14_p4 = scmp.ge.s32.totalorder %s17_s21, 4  }
 0x316   :  { %16 = sbr.rel (!%p14_p4) target bundleno = 1 (0x1), region = 82 }

</bundles_post_ra>
